<compile_context>
chip_gen: v6e
topology: v6e:2x2x1
jax: 0.10.0
libtpu: 0.0.40
codegen_flags: <defaults>
</compile_context>

<pallas_src>
import functools

import jax
import jax.numpy as jnp
from jax.experimental import pallas as pl
from jax.experimental.pallas import tpu as pltpu

_LANE = 128
_MAX_TN = 4096                 # vreg/VMEM-intermediate pressure cap on lane tile
_TARGET_STEP_BYTES = 2 << 20   # aim for >= ~2 MiB of in+out HBM traffic per step


# ------------------------------- tile sizing -------------------------------- #
def _round_up(v, m):
    return ((v + m - 1) // m) * m


def _vmem_capacity_bytes():
    try:
        return int(pltpu.get_tpu_info().vmem_capacity_bytes)
    except Exception:  # pragma: no cover - conservative fallback (v7x per-TC)
        return 64 << 20


def _pick_tile_and_vmem_limit(n, c_in, c_out, itemsize, weight_bytes, batch):
    """Choose the pixel (lane) tile TN and an explicit VMEM limit."""
    per_col = (c_in + c_out) * itemsize          # in + out bytes per pixel column
    # Big enough to amortize the ~0.35us fixed per-grid-step overhead.
    tn = _round_up(max(_LANE, -(-_TARGET_STEP_BYTES // per_col)), _LANE)
    # VMEM budget: double-buffered input + output tiles + (folded) weights.
    cap = _vmem_capacity_bytes()
    budget = max(1 << 20, int(cap * 0.6) - weight_bytes)
    tn_vmem = max(_LANE, (budget // (2 * per_col)) // _LANE * _LANE)
    tn = min(tn, _MAX_TN, tn_vmem, _round_up(n, _LANE))
    # v7x has 2 TensorCores per chip: make sure small single-batch calls still
    # produce >= 2 grid steps along a "parallel" axis.
    if batch * (-(-n // tn)) < 2 and n > 2 * _LANE:
        tn = _round_up(-(-n // 2), _LANE)
    usage = 2 * per_col * tn + weight_bytes + (2 << 20)
    vmem_limit = int(min(cap * 0.9, max(usage, 32 << 20)))
    return tn, vmem_limit


# ----------------------------- Pallas kernels ------------------------------ #
def _norm_stats(xf, eps):
    """xf: (C, TN) f32 block. Returns centered x and per-column inverse scale."""
    c = xf.shape[0]
    ones = jnp.ones((1, c), jnp.float32)
    # Channel reductions on the MXU (otherwise idle) instead of XLU sublane
    # reduces; two-pass (mean then centered var) matches the reference math.
    mean = jnp.dot(ones, xf, preferred_element_type=jnp.float32) * (1.0 / c)   # (1, TN)
    xc = xf - mean
    var = jnp.dot(ones, xc * xc, preferred_element_type=jnp.float32) * (1.0 / c)
    # eps OUTSIDE the sqrt (decoder.py LayerNorm semantics); (1,TN) reciprocal
    # + broadcast multiply instead of a full-tile divide.
    inv = pl.reciprocal(jnp.sqrt(var) + eps, approx=False)                      # (1, TN)
    return xc, inv


def _prenorm_kernel(x_ref, g_ref, b_ref, o_ref, *, eps):
    xc, inv = _norm_stats(x_ref[...].astype(jnp.float32), eps)
    xn = (xc * inv) * g_ref[...] + b_ref[...]
    o_ref[...] = xn.astype(o_ref.dtype)


def _prenorm_pointwise_kernel(x_ref, w_ref, wb_ref, o_ref, *, eps):
    # LayerNorm affine is folded into (w, wb) host-side, so the normalized
    # tensor xn is never materialized: out = Wg @ ((x - mean) * inv) + b_fold.
    xc, inv = _norm_stats(x_ref[...].astype(jnp.float32), eps)
    y = (xc * inv).astype(w_ref.dtype)
    acc = jnp.dot(w_ref[...], y, preferred_element_type=jnp.float32)  # (O, TN) MXU
    o_ref[...] = (acc + wb_ref[...]).astype(o_ref.dtype)


# -------------------------------- wrapper ----------------------------------- #
def prenorm(x, g, b, *, eps=1e-8, fn_w=None, fn_b=None, fn=None):
    """PreNorm.forward: fn(LayerNorm over channel dim of NCHW x).

    x : (B, C, H, W)  float32 or bfloat16 (statistics always computed in f32)
    g, b : (C,) LayerNorm affine params (torch shapes (1,C,1,1) flattened)
    fn_w, fn_b : optional (O, C), (O,) pointwise 1x1-conv fn, fused in-kernel
    fn : optional arbitrary JAX callable applied to the normalized tensor
    """
    B, C, H, W = x.shape
    N = H * W
    itemsize = jnp.dtype(x.dtype).itemsize
    xr = x.reshape(B, C, N)            # pure reshape, no transpose / HBM copy
    g = g.reshape(-1)
    b = b.reshape(-1)

    if fn_w is not None:
        O = fn_w.shape[0]
        if fn_b is None:
            fn_b = jnp.zeros((O,), jnp.float32)
        # Fold the LayerNorm affine into the projection (numerically identical):
        #   fn_w @ (xn*g + b) + fn_b = (fn_w*g) @ xn + (fn_b + fn_w @ b)
        w_fold = (fn_w.astype(jnp.float32) * g.astype(jnp.float32)[None, :])
        b_fold = (fn_b.astype(jnp.float32)
                  + fn_w.astype(jnp.float32) @ b.astype(jnp.float32)).reshape(O, 1)
        weight_bytes = 2 * (w_fold.size + b_fold.size) * 4
        TN, vmem_limit = _pick_tile_and_vmem_limit(N, C, O, itemsize, weight_bytes, B)
        grid = (B, pl.cdiv(N, TN))
        cp = pltpu.CompilerParams(
            dimension_semantics=("parallel", "parallel"),
            vmem_limit_bytes=vmem_limit)
        out = pl.pallas_call(
            functools.partial(_prenorm_pointwise_kernel, eps=eps),
            out_shape=jax.ShapeDtypeStruct((B, O, N), x.dtype),
            grid=grid,
            in_specs=[
                pl.BlockSpec((None, C, TN), lambda i, j: (i, 0, j)),
                pl.BlockSpec((O, C), lambda i, j: (0, 0)),
                pl.BlockSpec((O, 1), lambda i, j: (0, 0)),
            ],
            out_specs=pl.BlockSpec((None, O, TN), lambda i, j: (i, 0, j)),
            compiler_params=cp,
        )(xr, w_fold, b_fold)
        return out.reshape(B, O, H, W)

    # Norm-only path (arbitrary fn applied afterwards as plain JAX).
    TN, vmem_limit = _pick_tile_and_vmem_limit(N, C, C, itemsize, 0, B)
    grid = (B, pl.cdiv(N, TN))
    cp = pltpu.CompilerParams(
        dimension_semantics=("parallel", "parallel"),
        vmem_limit_bytes=vmem_limit)
    g2 = g.astype(jnp.float32).reshape(C, 1)
    b2 = b.astype(jnp.float32).reshape(C, 1)
    out = pl.pallas_call(
        functools.partial(_prenorm_kernel, eps=eps),
        out_shape=jax.ShapeDtypeStruct((B, C, N), x.dtype),
        grid=grid,
        in_specs=[
            pl.BlockSpec((None, C, TN), lambda i, j: (i, 0, j)),
            pl.BlockSpec((C, 1), lambda i, j: (0, 0)),
            pl.BlockSpec((C, 1), lambda i, j: (0, 0)),
        ],
        out_specs=pl.BlockSpec((None, C, TN), lambda i, j: (i, 0, j)),
        compiler_params=cp,
    )(xr, g2, b2)
    out = out.reshape(B, C, H, W)
    # TODO(synk): arbitrary fn modules (attention / MLP stacks) are applied as
    # plain JAX here; only the pointwise 1x1-conv fn is fused in-kernel.
    return fn(out) if fn is not None else out


# ------------------------------- reference ---------------------------------- #
def prenorm_ref(x, g, b, fn_w=None, fn_b=None, eps=1e-8):
    x = x.astype(jnp.float32)
    mean = jnp.mean(x, axis=1, keepdims=True)
    var = jnp.mean((x - mean) ** 2, axis=1, keepdims=True)
    std = jnp.sqrt(var)
    xn = (x - mean) / (std + eps) * g[None, :, None, None] + b[None, :, None, None]
    if fn_w is None:
        return xn
    return jnp.einsum("oc,bchw->bohw", fn_w, xn) + fn_b[None, :, None, None]


if __name__ == "__main__":
    B, C, H, W = 2, 32, 16, 16
    O = 32
    EPS = 1e-8

    key = jax.random.PRNGKey(0)
    kx, kg, kb, kw, kwb = jax.random.split(key, 5)
    x = jax.random.normal(kx, (B, C, H, W), jnp.float32)
    g = 1.0 + 0.1 * jax.random.normal(kg, (C,), jnp.float32)
    b = 0.1 * jax.random.normal(kb, (C,), jnp.float32)
    fn_w = jax.random.normal(kw, (O, C), jnp.float32) / jnp.sqrt(C)
    fn_b = 0.1 * jax.random.normal(kwb, (O,), jnp.float32)

    # PreNorm with fn = pointwise 1x1 conv, fused (with affine folded) in-kernel.
    fused = jax.jit(functools.partial(prenorm, eps=EPS))
    out = fused(x, g, b, fn_w=fn_w, fn_b=fn_b)
    jax.block_until_ready(out)
    assert out.shape == (B, O, H, W), out.shape
    assert bool(jnp.all(jnp.isfinite(out)))
    ref = prenorm_ref(x, g, b, fn_w, fn_b, EPS)
    err = float(jnp.max(jnp.abs(out - ref)))
    assert err < 1e-3, err

    # PreNorm with an arbitrary (non-fused) fn: norm kernel + JAX callable.
    scale_fn = lambda y: 2.0 * y
    norm_only = jax.jit(lambda xx, gg, bb: prenorm(xx, gg, bb, eps=EPS, fn=scale_fn))
    out2 = norm_only(x, g, b)
    jax.block_until_ready(out2)
    assert out2.shape == (B, C, H, W), out2.shape
    ref2 = 2.0 * prenorm_ref(x, g, b, eps=EPS)
    err2 = float(jnp.max(jnp.abs(out2 - ref2)))
    assert err2 < 2e-4, err2

    print("KERNEL_OK")
</pallas_src>

<mosaic_0001>
module attributes {stable_mosaic.version = 11 : i64} {
  func.func @_prenorm_pointwise_kernel(%arg0: i32, %arg1: i32, %arg2: memref<1x32x256xf32, #tpu.memory_space<vmem>>, %arg3: memref<32x32xf32, #tpu.memory_space<vmem>>, %arg4: memref<32x1xf32, #tpu.memory_space<vmem>>, %arg5: memref<1x32x256xf32, #tpu.memory_space<vmem>>) attributes {dimension_semantics = [#tpu.dimension_semantics<parallel>, #tpu.dimension_semantics<parallel>], iteration_bounds = array<i64: 2, 1>, scalar_prefetch = 0 : i64, scratch_operands = 0 : i64, tpu.core_type = #tpu.core_type<tc>, window_params = [{transform_indices = @transform_0, window_bounds = array<i64: 1, 32, 256>}, {pipeline_mode = #tpu.pipeline_mode<synchronous>, transform_indices = @transform_1, window_bounds = array<i64: 32, 32>}, {pipeline_mode = #tpu.pipeline_mode<synchronous>, transform_indices = @transform_2, window_bounds = array<i64: 32, 1>}, {transform_indices = @transform_3, window_bounds = array<i64: 1, 32, 256>}]} {
    %c0 = arith.constant 0 : index
    %c0_0 = arith.constant 0 : index
    %c0_1 = arith.constant 0 : index
    %0 = vector.load %arg2[%c0, %c0_0, %c0_1] : memref<1x32x256xf32, #tpu.memory_space<vmem>>, vector<1x32x256xf32>
    %1 = vector.shape_cast %0 : vector<1x32x256xf32> to vector<32x256xf32>
    %cst = arith.constant 1.000000e+00 : f32
    %2 = vector.broadcast %cst : f32 to vector<1x32xf32>
    %cst_2 = arith.constant dense<0.000000e+00> : vector<1x256xf32>
    %3 = tpu.matmul %2, %1, %cst_2 {dimension_numbers = #tpu.dot_dimension_numbers<[1], [0], [0], [1], [0, 0, 1, 1], [], []>} : vector<1x32xf32>, vector<32x256xf32>, vector<1x256xf32> -> vector<1x256xf32>
    %cst_3 = arith.constant 3.125000e-02 : f32
    %4 = vector.broadcast %cst_3 : f32 to vector<1x256xf32>
    %5 = arith.mulf %3, %4 : vector<1x256xf32>
    %6 = vector.broadcast %5 : vector<1x256xf32> to vector<32x256xf32>
    %7 = arith.subf %1, %6 : vector<32x256xf32>
    %8 = arith.mulf %7, %7 : vector<32x256xf32>
    %cst_4 = arith.constant dense<0.000000e+00> : vector<1x256xf32>
    %9 = tpu.matmul %2, %8, %cst_4 {dimension_numbers = #tpu.dot_dimension_numbers<[1], [0], [0], [1], [0, 0, 1, 1], [], []>} : vector<1x32xf32>, vector<32x256xf32>, vector<1x256xf32> -> vector<1x256xf32>
    %cst_5 = arith.constant 3.125000e-02 : f32
    %10 = vector.broadcast %cst_5 : f32 to vector<1x256xf32>
    %11 = arith.mulf %9, %10 : vector<1x256xf32>
    %12 = math.sqrt %11 : vector<1x256xf32>
    %cst_6 = arith.constant 9.99999993E-9 : f32
    %13 = vector.broadcast %cst_6 : f32 to vector<1x256xf32>
    %14 = arith.addf %12, %13 : vector<1x256xf32>
    %15 = tpu.reciprocal %14 : vector<1x256xf32> -> vector<1x256xf32>
    %16 = vector.broadcast %15 : vector<1x256xf32> to vector<32x256xf32>
    %17 = arith.mulf %7, %16 : vector<32x256xf32>
    %c0_7 = arith.constant 0 : index
    %c0_8 = arith.constant 0 : index
    %18 = vector.load %arg3[%c0_7, %c0_8] : memref<32x32xf32, #tpu.memory_space<vmem>>, vector<32x32xf32>
    %cst_9 = arith.constant dense<0.000000e+00> : vector<32x256xf32>
    %19 = tpu.matmul %18, %17, %cst_9 {dimension_numbers = #tpu.dot_dimension_numbers<[1], [0], [0], [1], [0, 0, 1, 1], [], []>} : vector<32x32xf32>, vector<32x256xf32>, vector<32x256xf32> -> vector<32x256xf32>
    %c0_10 = arith.constant 0 : index
    %c0_11 = arith.constant 0 : index
    %20 = vector.load %arg4[%c0_10, %c0_11] : memref<32x1xf32, #tpu.memory_space<vmem>>, vector<32x1xf32>
    %21 = vector.broadcast %20 : vector<32x1xf32> to vector<32x256xf32>
    %22 = arith.addf %19, %21 : vector<32x256xf32>
    %c0_12 = arith.constant 0 : index
    %c0_13 = arith.constant 0 : index
    %c0_14 = arith.constant 0 : index
    %23 = vector.load %arg5[%c0_12, %c0_13, %c0_14] : memref<1x32x256xf32, #tpu.memory_space<vmem>>, vector<1x32x256xf32>
    %24 = vector.shape_cast %23 : vector<1x32x256xf32> to vector<32x256xf32>
    %25 = vector.shape_cast %22 : vector<32x256xf32> to vector<1x32x256xf32>
    tpu.vector_store %arg5[%c0_12, %c0_13, %c0_14], %25 {strides = array<i32>} : memref<1x32x256xf32, #tpu.memory_space<vmem>>, vector<1x32x256xf32>,
    return
  }
  func.func @transform_0(%arg0: i32, %arg1: i32) -> (i32, i32, i32) {
    %c0_i32 = arith.constant 0 : i32
    %c0_i32_0 = arith.constant 0 : i32
    return %arg0, %c0_i32, %arg1 : i32, i32, i32
  }
  func.func @transform_1(%arg0: i32, %arg1: i32) -> (i32, i32) {
    %c0_i32 = arith.constant 0 : i32
    %c0_i32_0 = arith.constant 0 : i32
    %c0_i32_1 = arith.constant 0 : i32
    return %c0_i32, %c0_i32_0 : i32, i32
  }
  func.func @transform_2(%arg0: i32, %arg1: i32) -> (i32, i32) {
    %c0_i32 = arith.constant 0 : i32
    %c0_i32_0 = arith.constant 0 : i32
    %c0_i32_1 = arith.constant 0 : i32
    return %c0_i32, %c0_i32_0 : i32, i32
  }
  func.func @transform_3(%arg0: i32, %arg1: i32) -> (i32, i32, i32) {
    %c0_i32 = arith.constant 0 : i32
    %c0_i32_0 = arith.constant 0 : i32
    return %arg0, %c0_i32, %arg1 : i32, i32, i32
  }
}

</mosaic_0001>

<bundles_post_ra>
// kernel: prenorm.1
= control target key start
LH: loop header
LB: loop body
LE: loop exit
PB: predicated region body
PF: predicated region fallthrough
CT: control target
= control target key end

     0   :  { %s753_s12 = smov 0   ;;  %s755_s13 = smov 0   ;;  %s875_s0 = inlined_call_operand.vmem [shape: f32[2,32,256], index: 0, kind: input, shape index: {}]   ;;  %s876_s1 = inlined_call_operand.vmem [shape: f32[32,32], index: 1, kind: input, shape index: {}]   ;;  %s877_s2 = inlined_call_operand.vmem [shape: f32[32,1], index: 2, kind: input, shape index: {}]   ;;  %s878_s3 = inlined_call_operand.vmem [shape: f32[2,32,256], index: 3, kind: output, shape index: {}]  }
   0x1   :  { %s757_s14 = smov 0  }
   0x2 LB: > { %s25_s15 = sadd.s32 1, %s724_s13  ;;  %p654_p0 = scmp.ge.s32.totalorder %s728_s14, 1  ;;  %s728_s14 = sphi %s757_s14, %s13_s14   ;;  %s724_s13 = sphi %s755_s13, %s880_s13   ;;  %s720_s12 = sphi %s753_s12, %s879_s12  }
   0x3   : > { %p27_p1 = scmp.ge.s32.totalorder %s25_s15, 2  ;;  %p158_p2 = scmp.lt.s32.totalorder %s728_s14, 3 }
   0x5   : > { %s882_s15 = smov (%p27_p1, %s25_s15), 0  ;;  %p159_p3 = pnand %p654_p0, %p158_p2 }
   0x6   : > { %p191_p4 = scmp.lt.s32.totalorder (!%p159_p3), %s720_s12, 1 }
   0x7   : > { %162 = sbr.rel (%p159_p3) target bundleno = 688 (0x2b0), region = 32 }
   0xc   : > { %v730_v0 = vmov 0.0   ;;  %s884_s12 = smov (!%p191_p4, %s720_s12), 1  ;;  %vm218_vm0 = vcmask 261120   ;;  %v731_v9 = vmov 1.0   ;;  %v295_v10 = vlaneseq  ;;  %v430_v35 = vld [vmem:[%s877_s2] sm:$0xff]  ;;  %v432_v36 = vld [vmem:[%s877_s2 + $0x10] sm:$0xff] }
   0xd   : > { %286 = vmatprep.mubr.f32.mxu1 %v730_v0  ;;  %530 = vmatprep.mubr.f32.mxu0 %v730_v0  ;;  %s667_s16 = sshll.u32 %s884_s12, 6  ;;  %v732_v37 = vmov 0   ;;  %v431_v38 = vld [vmem:[%s877_s2 + $0x8] sm:$0xff]  ;;  %v433_v39 = vld [vmem:[%s877_s2 + $0x18] sm:$0xff] }
   0xe   : > { %s198_s19 = scalar_lea.vmem %s875_s0, %s667_s16  ;;  %v296_v11 = vshrl.u32 %v295_v10, 7  ;;  %696 = vset.pattern.permute.xlu0 %v732_v37  ;;  %697 = vset.pattern.permute.xlu1 %v732_v37  ;;  %s208_s11 = scalar_lea.vmem %s878_s3, %s667_s16 }
   0xf   : > { %v217_v1 = vld [vmem:[%s198_s19 + $0x38] sm:$0xff]  ;;  %v216_v2 = vld [vmem:[%s198_s19 + $0x30] sm:$0xff]  ;;  %v215_v3 = vld [vmem:[%s198_s19 + $0x28] sm:$0xff]  ;;  %436 = vperm.xlu0 %696, %v430_v35   ;;  %446 = vperm.xlu1 %697, %v432_v36  }
  0x10   : > { %246 = vmatprep.subr.mxu1 %v217_v1  ;;  %v214_v4 = vld [vmem:[%s198_s19 + $0x20] sm:$0xff]  ;;  %v213_v5 = vld [vmem:[%s198_s19 + $0x18] sm:$0xff]  ;;  %v212_v6 = vld [vmem:[%s198_s19 + $0x10] sm:$0xff]  ;;  %v783_v12 = vsub.s32 0, %v296_v11 }
  0x11   : > { %247 = vmatpush1.msra.mxu1 %v216_v2  ;;  %v211_v7 = vld [vmem:[%s198_s19 + $0x8] sm:$0xff]  ;;  %v210_v8 = vld [vmem:[%s198_s19] sm:$0xff] }
  0x12   : > { %248 = vmatprep.subr.mxu1 %v215_v3 }
  0x13   : > { %249 = vmatpush1.msra.mxu1 %v214_v4  ;;  %441 = vperm.xlu0 %696, %v431_v38  }
  0x14   : > { %250 = vmatprep.subr.mxu1 %v213_v5  ;;  %451 = vperm.xlu1 %697, %v433_v39  }
  0x15   : > { %251 = vmatpush1.msra.mxu1 %v212_v6 }
  0x16   : > { %252 = vmatprep.subr.mxu1 %v211_v7 }
  0x17   : > { %253 = vmatpush1.msra.mxu1 %v210_v8 }
  0x18   : > { %659 = vmatmul.mubr.msk.f32.vlgmr.msra.gmra.mxu1 %vm218_vm0, %v731_v9 }
  0x19   : > { %383 = vmatprep.mubr.f32.mxu1 %v730_v0 }
  0xd8   : > { %v288_v13 = vpop.f32.mrf.mxu1 }
  0xd9   : > { %v293_v14 = vmul.f32 0.03125, %v288_v13 }
  0xda   : > { %v290_v15 = vpop.f32.mrf.mxu1 }
  0xdb   : > { %v298_v16 = vrot.slane %v293_v14, %v783_v12  ;;  %v294_v17 = vmul.f32 0.03125, %v290_v15 }
  0xdd   : > { %v302_v18 = vrot.slane %v294_v17, %v783_v12  ;;  %v787_v19 = vsub.f32 %v216_v2, %v298_v16  ;;  %v793_v22 = vsub.f32 %v214_v4, %v298_v16  ;;  %v801_v26 = vsub.f32 %v212_v6, %v298_v16  ;;  %v427_v6 = vld [vmem:[%s876_s1 + $0x8] sm:$0xff] }
  0xde   : > { %v809_v30 = vsub.f32 %v210_v8, %v298_v16  ;;  %v429_v8 = vld [vmem:[%s876_s1 + $0x18] sm:$0xff]  ;;  %v447_v16 = vpop.permute.xlu1 %446 }
  0xdf   : > { %v789_v20 = vsub.f32 %v217_v1, %v302_v18  ;;  %v791_v21 = vsub.f32 %v215_v3, %v302_v18  ;;  %v797_v24 = vsub.f32 %v213_v5, %v302_v18  ;;  %v317_v25 = vmul.f32 %v787_v19, %v787_v19  ;;  %v426_v5 = vld [vmem:[%s876_s1] sm:$0xff] }
  0xe0   : > { %v805_v28 = vsub.f32 %v211_v7, %v302_v18  ;;  %v315_v29 = vmul.f32 %v793_v22, %v793_v22  ;;  %v313_v32 = vmul.f32 %v801_v26, %v801_v26  ;;  %v311_v34 = vmul.f32 %v809_v30, %v809_v30  ;;  %v428_v7 = vld [vmem:[%s876_s1 + $0x10] sm:$0xff] }
  0xe1   : > { %v318_v23 = vmul.f32 %v789_v20, %v789_v20  ;;  %v316_v27 = vmul.f32 %v791_v21, %v791_v21  ;;  %v314_v31 = vmul.f32 %v797_v24, %v797_v24 }
  0xe2   : > { %v312_v33 = vmul.f32 %v805_v28, %v805_v28 }
  0xe3   : > { %343 = vmatprep.subr.mxu1 %v318_v23  ;;  %v452_v23 = vpop.permute.xlu1 %451 }
  0xe4   : > { %344 = vmatpush1.msra.mxu1 %v317_v25 }
  0xe5   : > { %345 = vmatprep.subr.mxu1 %v316_v27 }
  0xe6   : > { %346 = vmatpush1.msra.mxu1 %v315_v29 }
  0xe7   : > { %347 = vmatprep.subr.mxu1 %v314_v31 }
  0xe8   : > { %348 = vmatpush1.msra.mxu1 %v313_v32 }
  0xe9   : > { %349 = vmatprep.subr.mxu1 %v312_v33 }
  0xea   : > { %350 = vmatpush1.msra.mxu1 %v311_v34 }
  0xeb   : > { %660 = vmatmul.mubr.msk.f32.vlgmr.msra.gmra.mxu1 %vm218_vm0, %v731_v9  ;;  %v437_v9 = vpop.permute.xlu0 %436 }
  0xef   : > { %v442_v13 = vpop.permute.xlu0 %441 }
 0x1ab   : > { %v385_v40 = vpop.f32.mrf.mxu1 }
 0x1ac   : > { %v390_v41 = vmul.f32 0.03125, %v385_v40 }
 0x1ad   : > { %v387_v42 = vpop.f32.mrf.mxu1 }
 0x1ae   : > { %698 = vrsqrt.f32 %v390_v41  ;;  %v391_v43 = vmul.f32 0.03125, %v387_v42  ;;  %vm394_vm1 = vcmp.eq.f32.partialorder %v390_v41, inf  ;;  %v397_v46 = vand.u32 2147483648, %v390_v41 }
 0x1af   : > { %vm396_vm2 = vcmp.eq.f32.partialorder %v390_v41, 0.0 }
 0x1b0   : > { %700 = vrsqrt.f32 %v391_v43  ;;  %vm401_vm3 = vcmp.eq.f32.partialorder %v391_v43, inf  ;;  %v404_v52 = vand.u32 2147483648, %v391_v43  ;;  %vm403_vm4 = vcmp.eq.f32.partialorder %v391_v43, 0.0 }
 0x1bb   : > { %v699_v44 = vpop.eup %698 }
 0x1bc   : > { %v393_v45 = vmul.f32 %v699_v44, %v390_v41 }
 0x1bd   : > { %v701_v47 = vpop.eup %700 }
 0x1be   : > { %v395_v48 = vsel %vm394_vm1, %v390_v41, %v393_v45  ;;  %v400_v50 = vmul.f32 %v701_v47, %v391_v43 }
 0x1bf   : > { %v398_v49 = vsel %vm396_vm2, %v397_v46, %v395_v48 }
 0x1c0   : > { %v406_v51 = vadd.f32 1e-08, %v398_v49  ;;  %v402_v53 = vsel %vm401_vm3, %v391_v43, %v400_v50 }
 0x1c1   : > { %v405_v54 = vsel %vm403_vm4, %v404_v52, %v402_v53 }
 0x1c2   : > { %702 = vrcp.f32 %v406_v51  ;;  %v407_v55 = vadd.f32 1e-08, %v405_v54 }
 0x1c4   : > { %704 = vrcp.f32 %v407_v55 }
 0x1cf   : > { %v703_v56 = vpop.eup %702 }
 0x1d0   : > { %v413_v58 = vrot.slane %v703_v56, %v783_v12 }
 0x1d1   : > { %v705_v57 = vpop.eup %704 }
 0x1d2   : > { %v417_v59 = vrot.slane %v705_v57, %v783_v12  ;;  %v424_v61 = vmul.f32 %v413_v58, %v787_v19  ;;  %v422_v63 = vmul.f32 %v413_v58, %v793_v22  ;;  %v420_v2 = vmul.f32 %v413_v58, %v801_v26 }
 0x1d3   : > { %v418_v4 = vmul.f32 %v413_v58, %v809_v30 }
 0x1d4   : > { %v425_v60 = vmul.f32 %v417_v59, %v789_v20  ;;  %v423_v62 = vmul.f32 %v417_v59, %v791_v21  ;;  %v421_v1 = vmul.f32 %v417_v59, %v797_v24  ;;  %v419_v3 = vmul.f32 %v417_v59, %v805_v28 }
 0x1d6   : > { %490 = vmatprep.subr.mxu0 %v425_v60 }
 0x1d7   : > { %491 = vmatpush1.msra.mxu0 %v424_v61 }
 0x1d8   : > { %492 = vmatprep.subr.mxu0 %v423_v62 }
 0x1d9   : > { %493 = vmatpush1.msra.mxu0 %v422_v63 }
 0x1da   : > { %494 = vmatprep.subr.mxu0 %v421_v1 }
 0x1db   : > { %495 = vmatpush1.msra.mxu0 %v420_v2 }
 0x1dc   : > { %496 = vmatprep.subr.mxu0 %v419_v3 }
 0x1dd   : > { %497 = vmatpush1.msra.mxu0 %v418_v4 }
 0x1de   : > { %661 = vmatmul.mubr.msk.f32.vlgmr.msra.gmra.mxu0 %vm218_vm0, %v426_v5 }
 0x1df   : > { %536 = vmatprep.mubr.f32.mxu0 %v730_v0 }
 0x1e2   : > { %662 = vmatmul.mubr.msk.f32.gmra.mxu0 %vm218_vm0, %v427_v6 }
 0x1e3   : > { %542 = vmatprep.mubr.f32.mxu0 %v730_v0 }
 0x1e6   : > { %663 = vmatmul.mubr.msk.f32.gmra.mxu0 %vm218_vm0, %v428_v7 }
 0x1e7   : > { %548 = vmatprep.mubr.f32.mxu0 %v730_v0 }
 0x1ea   : > { %664 = vmatmul.mubr.msk.f32.gmra.mxu0 %vm218_vm0, %v429_v8 }
 0x29e   : > { %v532_v10 = vpop.f32.mrf.mxu0 }
 0x29f   : > { %v533_v11 = vadd.f32 %v532_v10, %v437_v9 }
 0x2a0   : > { %v534_v12 = vpop.f32.mrf.mxu0 }
 0x2a1   : > { %555 = vst [vmem:[%s208_s11] sm:$0xff] %v533_v11  ;;  %v535_v14 = vadd.f32 %v534_v12, %v437_v9 }
 0x2a2   : > { %v538_v15 = vpop.f32.mrf.mxu0 }
 0x2a3   : > { %556 = vst [vmem:[%s208_s11 + $0x8] sm:$0xff] %v535_v14  ;;  %v539_v0 = vadd.f32 %v538_v15, %v442_v13 }
 0x2a4   : > { %v540_v17 = vpop.f32.mrf.mxu0 }
 0x2a5   : > { %557 = vst [vmem:[%s208_s11 + $0x10] sm:$0xff] %v539_v0  ;;  %v541_v18 = vadd.f32 %v540_v17, %v442_v13 }
 0x2a6   : > { %v544_v19 = vpop.f32.mrf.mxu0 }
 0x2a7   : > { %558 = vst [vmem:[%s208_s11 + $0x18] sm:$0xff] %v541_v18  ;;  %v545_v20 = vadd.f32 %v544_v19, %v447_v16 }
 0x2a8   : > { %v546_v21 = vpop.f32.mrf.mxu0 }
 0x2a9   : > { %559 = vst [vmem:[%s208_s11 + $0x20] sm:$0xff] %v545_v20  ;;  %v547_v22 = vadd.f32 %v546_v21, %v447_v16 }
 0x2aa   : > { %v550_v24 = vpop.f32.mrf.mxu0 }
 0x2ab   : > { %560 = vst [vmem:[%s208_s11 + $0x28] sm:$0xff] %v547_v22  ;;  %v551_v25 = vadd.f32 %v550_v24, %v452_v23 }
 0x2ac   : > { %v552_v26 = vpop.f32.mrf.mxu0 }
 0x2ad   : > { %561 = vst [vmem:[%s208_s11 + $0x30] sm:$0xff] %v551_v25  ;;  %v553_v27 = vadd.f32 %v552_v26, %v452_v23 }
 0x2af   : > { %562 = vst [vmem:[%s208_s11 + $0x38] sm:$0xff] %v553_v27 }
 0x2b0 PF: > { %s13_s14 = sadd.s32 1, %s728_s14   ;;  %s879_s12 = smov %s724_s13 }
 0x2b1   : > { %p10_p5 = scmp.ge.s32.totalorder %s13_s14, 4   ;;  %s880_s13 = smov %s882_s15 }
 0x2b3   :  { %12 = sbr.rel (!%p10_p5) target bundleno = 2 (0x2), region = 62 }

</bundles_post_ra>
